<compile_context>
chip_gen: v6e
topology: v6e:2x2x1
jax: 0.10.0
libtpu: 0.0.40
codegen_flags: <defaults>
</compile_context>

<pallas_src>
import jax
import jax.numpy as jnp
from jax.experimental import pallas as pl
from jax.experimental.pallas import tpu as pltpu


def _layernorm_nchw_kernel(x_ref, w_ref, b_ref, o_ref):
    # x_ref/o_ref: (C, T)  -- channels on sublanes, spatial positions on lanes
    # w_ref/b_ref: (C, 1)  -- per-channel affine, broadcast along lanes
    x = x_ref[...].astype(jnp.float32)
    mu = jnp.mean(x, axis=0, keepdims=True)                # (1, T)
    xc = x - mu
    var = jnp.mean(xc * xc, axis=0, keepdims=True)         # (1, T), unbiased=False
    inv = jax.lax.rsqrt(var + 1e-5)                        # eps inside the sqrt
    w = w_ref[...].astype(jnp.float32)                     # (C, 1)
    b = b_ref[...].astype(jnp.float32)                     # (C, 1)
    o_ref[...] = ((xc * inv) * w + b).astype(o_ref.dtype)


def _choose_tile_hw(hw, c, itemsize, target_block_bytes):
    """Lane-dense tile (multiple of 128), ~target_block_bytes per block,
    never larger than the (128-rounded) spatial extent."""
    hw_pad = ((hw + 127) // 128) * 128
    tile = (target_block_bytes // (c * itemsize)) // 128 * 128
    return int(max(128, min(hw_pad, tile)))


def with_bias_layernorm_nchw(x_nchw, weight, bias, *, target_block_bytes=2 << 20):
    """WithBias_LayerNorm over the channel dim of an NCHW tensor
    (equivalent to the PyTorch module applied after the canonical to_3d
    rearrange: normalize over C per spatial position)."""
    B, C, H, W = x_nchw.shape
    HW = H * W
    x3 = x_nchw.reshape(B, C, HW)                # contiguous reshape, no HBM copy
    tile_hw = _choose_tile_hw(HW, C, x3.dtype.itemsize, target_block_bytes)
    grid = (B, pl.cdiv(HW, tile_hw))             # ragged last block handled by Pallas

    w2 = weight.reshape(C, 1)
    b2 = bias.reshape(C, 1)

    out = pl.pallas_call(
        _layernorm_nchw_kernel,
        out_shape=jax.ShapeDtypeStruct((B, C, HW), x3.dtype),
        grid_spec=pltpu.PrefetchScalarGridSpec(
            num_scalar_prefetch=0,
            grid=grid,
            in_specs=[
                pl.BlockSpec((None, C, tile_hw), lambda b, j: (b, 0, j)),
                pl.BlockSpec((C, 1), lambda b, j: (0, 0)),
                pl.BlockSpec((C, 1), lambda b, j: (0, 0)),
            ],
            out_specs=pl.BlockSpec((None, C, tile_hw), lambda b, j: (b, 0, j)),
        ),
        compiler_params=pltpu.CompilerParams(
            dimension_semantics=("parallel", "parallel")),
    )(x3, w2, b2)
    return out.reshape(B, C, H, W)


def _reference_nchw(x, weight, bias):
    mu = jnp.mean(x, axis=1, keepdims=True)
    var = jnp.mean((x - mu) ** 2, axis=1, keepdims=True)
    return ((x - mu) / jnp.sqrt(var + 1e-5) * weight[None, :, None, None]
            + bias[None, :, None, None])


if __name__ == "__main__":
    key = jax.random.PRNGKey(0)
    kx, kw, kb, kx2 = jax.random.split(key, 4)

    B, C, H, W = 2, 32, 16, 16
    x = jax.random.normal(kx, (B, C, H, W), dtype=jnp.float32)
    # Module __init__ uses ones/zeros; use non-trivial params here to exercise
    # the affine path of the kernel (same forward formula either way).
    weight = 1.0 + 0.1 * jax.random.normal(kw, (C,), dtype=jnp.float32)
    bias = 0.1 * jax.random.normal(kb, (C,), dtype=jnp.float32)

    out = jax.block_until_ready(with_bias_layernorm_nchw(x, weight, bias))
    ref = _reference_nchw(x, weight, bias)
    assert jnp.max(jnp.abs(out - ref)) < 1e-4

    # Ragged spatial extent (H*W not a multiple of 128): exercises the
    # cdiv grid / clipped-store path with no padding copy.
    H2, W2 = 15, 15
    x2 = jax.random.normal(kx2, (B, C, H2, W2), dtype=jnp.float32)
    out2 = jax.block_until_ready(with_bias_layernorm_nchw(x2, weight, bias))
    ref2 = _reference_nchw(x2, weight, bias)
    assert jnp.max(jnp.abs(out2 - ref2)) < 1e-4

    print("KERNEL_OK")
</pallas_src>

<mosaic_0001>
module attributes {stable_mosaic.version = 11 : i64} {
  func.func @_layernorm_nchw_kernel(%arg0: i32, %arg1: i32, %arg2: memref<1x32x256xf32, #tpu.memory_space<vmem>>, %arg3: memref<32x1xf32, #tpu.memory_space<vmem>>, %arg4: memref<32x1xf32, #tpu.memory_space<vmem>>, %arg5: memref<1x32x256xf32, #tpu.memory_space<vmem>>) attributes {dimension_semantics = [#tpu.dimension_semantics<parallel>, #tpu.dimension_semantics<parallel>], iteration_bounds = array<i64: 2, 1>, scalar_prefetch = 0 : i64, scratch_operands = 0 : i64, tpu.core_type = #tpu.core_type<tc>, window_params = [{transform_indices = @transform_0, window_bounds = array<i64: 1, 32, 256>}, {pipeline_mode = #tpu.pipeline_mode<synchronous>, transform_indices = @transform_1, window_bounds = array<i64: 32, 1>}, {pipeline_mode = #tpu.pipeline_mode<synchronous>, transform_indices = @transform_2, window_bounds = array<i64: 32, 1>}, {transform_indices = @transform_3, window_bounds = array<i64: 1, 32, 256>}]} {
    %c0 = arith.constant 0 : index
    %c0_0 = arith.constant 0 : index
    %c0_1 = arith.constant 0 : index
    %0 = vector.load %arg2[%c0, %c0_0, %c0_1] : memref<1x32x256xf32, #tpu.memory_space<vmem>>, vector<1x32x256xf32>
    %1 = vector.shape_cast %0 : vector<1x32x256xf32> to vector<32x256xf32>
    %cst = arith.constant dense<0.000000e+00> : vector<256xf32>
    %2 = vector.multi_reduction <add>, %1, %cst [0] : vector<32x256xf32> to vector<256xf32>
    %3 = vector.shape_cast %2 : vector<256xf32> to vector<1x256xf32>
    %cst_2 = arith.constant 3.200000e+01 : f32
    %4 = vector.broadcast %cst_2 : f32 to vector<1x256xf32>
    %5 = arith.divf %3, %4 : vector<1x256xf32>
    %6 = vector.broadcast %5 : vector<1x256xf32> to vector<32x256xf32>
    %7 = arith.subf %1, %6 : vector<32x256xf32>
    %8 = arith.mulf %7, %7 : vector<32x256xf32>
    %cst_3 = arith.constant dense<0.000000e+00> : vector<256xf32>
    %9 = vector.multi_reduction <add>, %8, %cst_3 [0] : vector<32x256xf32> to vector<256xf32>
    %10 = vector.shape_cast %9 : vector<256xf32> to vector<1x256xf32>
    %cst_4 = arith.constant 3.200000e+01 : f32
    %11 = vector.broadcast %cst_4 : f32 to vector<1x256xf32>
    %12 = arith.divf %10, %11 : vector<1x256xf32>
    %cst_5 = arith.constant 9.99999974E-6 : f32
    %13 = vector.broadcast %cst_5 : f32 to vector<1x256xf32>
    %14 = arith.addf %12, %13 : vector<1x256xf32>
    %15 = math.rsqrt %14 : vector<1x256xf32>
    %c0_6 = arith.constant 0 : index
    %c0_7 = arith.constant 0 : index
    %16 = vector.load %arg3[%c0_6, %c0_7] : memref<32x1xf32, #tpu.memory_space<vmem>>, vector<32x1xf32>
    %c0_8 = arith.constant 0 : index
    %c0_9 = arith.constant 0 : index
    %17 = vector.load %arg4[%c0_8, %c0_9] : memref<32x1xf32, #tpu.memory_space<vmem>>, vector<32x1xf32>
    %18 = vector.broadcast %15 : vector<1x256xf32> to vector<32x256xf32>
    %19 = arith.mulf %7, %18 : vector<32x256xf32>
    %20 = vector.broadcast %16 : vector<32x1xf32> to vector<32x256xf32>
    %21 = arith.mulf %19, %20 : vector<32x256xf32>
    %22 = vector.broadcast %17 : vector<32x1xf32> to vector<32x256xf32>
    %23 = arith.addf %21, %22 : vector<32x256xf32>
    %c0_10 = arith.constant 0 : index
    %c0_11 = arith.constant 0 : index
    %c0_12 = arith.constant 0 : index
    %24 = vector.load %arg5[%c0_10, %c0_11, %c0_12] : memref<1x32x256xf32, #tpu.memory_space<vmem>>, vector<1x32x256xf32>
    %25 = vector.shape_cast %24 : vector<1x32x256xf32> to vector<32x256xf32>
    %26 = vector.shape_cast %23 : vector<32x256xf32> to vector<1x32x256xf32>
    tpu.vector_store %arg5[%c0_10, %c0_11, %c0_12], %26 {strides = array<i32>} : memref<1x32x256xf32, #tpu.memory_space<vmem>>, vector<1x32x256xf32>,
    return
  }
  func.func @transform_0(%arg0: i32, %arg1: i32) -> (i32, i32, i32) {
    %c0_i32 = arith.constant 0 : i32
    %c0_i32_0 = arith.constant 0 : i32
    return %arg0, %c0_i32, %arg1 : i32, i32, i32
  }
  func.func @transform_1(%arg0: i32, %arg1: i32) -> (i32, i32) {
    %c0_i32 = arith.constant 0 : i32
    %c0_i32_0 = arith.constant 0 : i32
    %c0_i32_1 = arith.constant 0 : i32
    return %c0_i32, %c0_i32_0 : i32, i32
  }
  func.func @transform_2(%arg0: i32, %arg1: i32) -> (i32, i32) {
    %c0_i32 = arith.constant 0 : i32
    %c0_i32_0 = arith.constant 0 : i32
    %c0_i32_1 = arith.constant 0 : i32
    return %c0_i32, %c0_i32_0 : i32, i32
  }
  func.func @transform_3(%arg0: i32, %arg1: i32) -> (i32, i32, i32) {
    %c0_i32 = arith.constant 0 : i32
    %c0_i32_0 = arith.constant 0 : i32
    return %arg0, %c0_i32, %arg1 : i32, i32, i32
  }
}

</mosaic_0001>

<bundles_post_ra>
// kernel: tpu_custom_call.1
= control target key start
LH: loop header
LB: loop body
LE: loop exit
PB: predicated region body
PF: predicated region fallthrough
CT: control target
= control target key end

     0   :  { %8 = vsyncpa [#allocation3], 0  ;;  %s872_s0 = inlined_call_operand.hbm [shape: f32[2,32,256], index: 0, kind: input, shape index: {}]   ;;  %s873_s1 = inlined_call_operand.vmem [shape: f32[32,1], index: 1, kind: input, shape index: {}]   ;;  %s874_s2 = inlined_call_operand.vmem [shape: f32[32,1], index: 2, kind: input, shape index: {}]   ;;  %s875_s3 = inlined_call_operand.hbm [shape: f32[2,32,256], index: 3, kind: output, shape index: {}]  }
   0x1   :  { %10 = vsyncpa [#allocation3 + $0x1], 0 }
   0x2   :  { %11 = vsyncpa [#allocation4], 0 }
   0x3   :  { %13 = vsyncpa [#allocation4 + $0x1], 0  ;;  %s688_s12 = smov 0   ;;  %s690_s13 = smov 0  }
   0x4   :  { %s692_s14 = smov 0   ;;  %s694_s15 = smov 0  }
   0x5   :  { %s696_s16 = smov 0   ;;  %s698_s17 = smov 0  }
   0x6 LB: > { %s461_s18 = sadd.s32 4294967295, %s659_s17   ;;  %s462_s19 = sadd.s32 4294967294, %s659_s17   ;;  %s659_s17 = sphi %s698_s17, %s19_s17   ;;  %s655_s16 = sphi %s696_s16, %s886_s16   ;;  %s651_s15 = sphi %s694_s15, %s885_s15   ;;  %s647_s14 = sphi %s692_s14, %s884_s14   ;;  %s643_s13 = sphi %s690_s13, %s883_s13   ;;  %s639_s12 = sphi %s688_s12, %s882_s12  }
   0x7   : > { %s31_s20 = sadd.s32 1, %s655_s16  ;;  %s40_s21 = sadd.s32 1, %s647_s14 }
   0x8   : > { %p33_p0 = scmp.ge.s32.totalorder %s31_s20, 2  ;;  %p47_p1 = scmp.ne.s32.totalorder %s647_s14, %s643_s13 }
   0x9   : > { %p48_p2 = scmp.eq.s32.totalorder %s659_s17, 0  ;;  %p53_p3 = scmp.ne.s32.totalorder %s643_s13, %s639_s12 }
   0xa   : > { %s888_s20 = smov (%p33_p0, %s31_s20), 0  ;;  %p54_p5 = scmp.eq.s32.totalorder %s461_s18, 0 }
   0xb   : > { %p729_p4 = por %p48_p2, %p47_p1  ;;  %s35_s23 = ssub.s32 %s655_s16, %s888_s20 }
   0xc   : > { %p121_p6 = scmp.eq.s32.totalorder %s461_s18, 1  ;;  %p38_p7 = scmp.eq.s32.totalorder %s35_s23, 0 }
   0xd   : > { %p735_p8 = por %p54_p5, %p53_p3  ;;  %p127_p10 = scmp.eq.s32.totalorder %s462_s19, 1 }
   0xe   : > { %p739_p9 = por %p121_p6, %p47_p1  ;;  %p490_p13 = scmp.lt.s32.totalorder %s659_s17, 2 }
   0xf   : > { %s744_s26 = scalar_select %p38_p7, %s647_s14, %s40_s21  }
  0x10   : > { %p746_p11 = por %p127_p10, %p53_p3  ;;  %s153_s28 = sand.u32 1, %s647_s14  }
  0x11   : > { %s465_s29 = sshll.u32 %s153_s28, 6  ;;  %s476_s30 = sshll.u32 %s655_s16, 10 }
  0x12   : > { %s165_s6 = scalar_lea.hbm %s872_s0, %s476_s30  ;;  %s157_s7 = scalar_lea.vmem [#allocation2], %s465_s29 }
  0x13   : > { %s166_s8 = sshll.u32 %s157_s7, 4  ;;  %p759_p0 = pnand %p490_p13, %p729_p4  ;;  %s167_s8 = int_to_ptr.vmem [resolvable:$true] %s166_s8 }
  0x14   : > { %p468_p1 = scmp.ge.s32.totalorder %s659_s17, 1  ;;  %s154_s10 = scalar_lea.sflag [#allocation3], %s153_s28 }
  0x15   : > { %p553_p2 = pneg %p759_p0  ;;  %s564_s11 = scalar_lea.vmem %s167_s8, 1024 }
  0x16   : > { %p565_p3 = scmp.ne.s32.totalorder %s167_s8, %s564_s11  ;;  %s661_s18 = smov [#allocation2]  }
  0x17   : > { %s569_s19 = sshll.u32 %s661_s18, 4  ;;  %s570_s19 = int_to_ptr.vmem [resolvable:$false] %s569_s19 }
  0x18   : > { %p567_p5 = pnand %p565_p3, %p553_p2  ;;  %s571_s21 = scalar_lea.vmem %s570_s19, 2048 }
  0x19   : > { %p572_p7 = scmp.lt.s32.totalorder %s167_s8, %s570_s19  ;;  %p573_p10 = scmp.lt.s32.totalorder %s571_s21, %s564_s11 }
  0x1a   : > { %p568_p6 = pneg %p567_p5 }
  0x1b   : > { %p574_p12 = por %p573_p10, %p572_p7 }
  0x1d   : > { %p575_p4 = pnand %p574_p12, %p568_p6 }
  0x1f   : > { %578 = shalt.err (!%p575_p4)
}
  0x20   : > { %s662_s22 = smov 256   ;;  %s663_s23 = smov 16  }
  0x21   : > { %485 = dma.hbm_to_vmem [thread:$0]  (!%p759_p0), %s165_s6, 1024, %s167_s8, %s154_s10, %s662_s22, %s662_s22, %s663_s23  }
  0x22   : > { %p174_p13 = scmp.lt.s32.totalorder %s659_s17, 3 }
  0x24   : > { %p175_p2 = pnand %p468_p1, %p174_p13 }
  0x25   : > { %s772_s28 = sand.u32 (!%p175_p2), 1, %s643_s13  }
  0x26   : > { %178 = sbr.rel (%p175_p2) target bundleno = 199 (0xc7), region = 32  ;;  %s469_s29 = sshll.u32 (!%p175_p2), %s772_s28, 6 }
  0x27   : > { %s181_s30 = scalar_lea.sflag (!%p175_p2), [#allocation3], %s772_s28  ;;  %s778_s4 = scalar_lea.vmem (!%p175_p2), [#allocation2], %s469_s29 }
  0x2b   : > { %630 = dma.done.wait (%p735_p8), %s181_s30, 1024  }
  0x2c   : > { %632 = vsyncadd (%p735_p8), %s181_s30, 4294966272  ;;  %v664_v0 = vmov 0   ;;  %v280_v1 = vld [vmem:[%s873_s1 + $0x10] sm:$0xff]  ;;  %v278_v2 = vld [vmem:[%s873_s1] sm:$0xff]  ;;  %s477_s8 = sshll.u32 %s651_s15, 10  ;;  %s359_s10 = scalar_lea.sflag [#allocation4], %s772_s28 }
  0x2d   : > { %546 = vset.pattern.permute.xlu1 %v664_v0  ;;  %545 = vset.pattern.permute.xlu0 %v664_v0  ;;  %v281_v3 = vld [vmem:[%s873_s1 + $0x18] sm:$0xff]  ;;  %v279_v4 = vld [vmem:[%s873_s1 + $0x8] sm:$0xff]  ;;  %v282_v6 = vld [vmem:[%s874_s2] sm:$0xff]  ;;  %s824_s15 = scalar_lea.hbm %s875_s3, %s477_s8  ;;  %s665_s11 = smov [#allocation5]  }
  0x2e   : > { %306 = vperm.xlu1 %546, %v280_v1   ;;  %296 = vperm.xlu0 %545, %v278_v2   ;;  %v283_v5 = vld [vmem:[%s874_s2 + $0x8] sm:$0xff]  ;;  %v285_v7 = vld [vmem:[%s874_s2 + $0x18] sm:$0xff]  ;;  %v284_v8 = vld [vmem:[%s874_s2 + $0x10] sm:$0xff]  ;;  %s583_s18 = sshll.u32 %s665_s11, 4  ;;  %s584_s18 = int_to_ptr.vmem [resolvable:$false] %s583_s18 }
  0x2f   : > { %v209_v9 = vld [vmem:[%s778_s4] sm:$0xff]  ;;  %v211_v10 = vld [vmem:[%s778_s4 + $0x10] sm:$0xff]  ;;  %v210_v11 = vld [vmem:[%s778_s4 + $0x8] sm:$0xff]  ;;  %s585_s19 = scalar_lea.vmem %s584_s18, 2048 }
  0x30   : > { %v212_v12 = vld [vmem:[%s778_s4 + $0x18] sm:$0xff]  ;;  %v217_v13 = vadd.f32 %v211_v10, %v209_v9  ;;  %v213_v14 = vld [vmem:[%s778_s4 + $0x20] sm:$0xff]  ;;  %v214_v16 = vld [vmem:[%s778_s4 + $0x28] sm:$0xff] }
  0x31   : > { %v226_v15 = vadd.f32 %v212_v12, %v210_v11  ;;  %v215_v18 = vld [vmem:[%s778_s4 + $0x30] sm:$0xff]  ;;  %v216_v20 = vld [vmem:[%s778_s4 + $0x38] sm:$0xff]  ;;  %s206_s4 = scalar_lea.vmem [#allocation5], %s469_s29 }
  0x32   : > { %311 = vperm.xlu1 %546, %v281_v3   ;;  %301 = vperm.xlu0 %545, %v279_v4   ;;  %v218_v17 = vadd.f32 %v217_v13, %v213_v14  ;;  %s374_s7 = sshll.u32 %s206_s4, 4  ;;  %s819_s7 = int_to_ptr.vmem [resolvable:$true] %s374_s7 }
  0x33   : > { %v227_v19 = vadd.f32 %v226_v15, %v214_v16  ;;  %s579_s24 = scalar_lea.vmem %s819_s7, 1024  ;;  %p586_p1 = scmp.lt.s32.totalorder %s819_s7, %s584_s18 }
  0x34   : > { %v219_v21 = vadd.f32 %v218_v17, %v215_v18  ;;  %p580_p8 = scmp.ne.s32.totalorder %s819_s7, %s579_s24  ;;  %p587_p3 = scmp.lt.s32.totalorder %s585_s19, %s579_s24 }
  0x35   : > { %v228_v22 = vadd.f32 %v227_v19, %v216_v20 }
  0x36   : > { %329 = vperm.xlu1 %546, %v283_v5   ;;  %324 = vperm.xlu0 %545, %v282_v6   ;;  %v220_v23 = vrot.slane %v219_v21, 4  ;;  %p581_p12 = pnand %p580_p8, %p739_p9  ;;  %p588_p5 = por %p587_p3, %p586_p1 }
  0x37   : > { %v229_v24 = vrot.slane %v228_v22, 4 }
  0x38   : > { %v221_v25 = vadd.f32 %v220_v23, %v219_v21  ;;  %p582_p0 = pneg %p581_p12 }
  0x39   : > { %v230_v26 = vadd.f32 %v229_v24, %v228_v22 }
  0x3a   : > { %339 = vperm.xlu1 %546, %v285_v7   ;;  %334 = vperm.xlu0 %545, %v284_v8   ;;  %v222_v27 = vrot.slane %v221_v25, 2  ;;  %p589_p6 = pnand %p588_p5, %p582_p0 }
  0x3b   : > { %v231_v28 = vrot.slane %v230_v26, 2 }
  0x3c   : > { %v223_v29 = vadd.f32 %v222_v27, %v221_v25 }
  0x3d   : > { %v232_v30 = vadd.f32 %v231_v28, %v230_v26 }
  0x3e   : > { %v224_v31 = vrot.slane %v223_v29, 1 }
  0x3f   : > { %v233_v32 = vrot.slane %v232_v30, 1 }
  0x40   : > { %v225_v33 = vadd.f32 %v224_v31, %v223_v29 }
  0x41   : > { %v234_v34 = vadd.f32 %v233_v32, %v232_v30 }
  0x42   : > { %v236_v35 = vmul.f32 0.03125, %v225_v33 }
  0x43   : > { %v237_v36 = vmul.f32 0.03125, %v234_v34 }
  0x44   : > { %v238_v37 = vsub.f32 %v209_v9, %v236_v35  ;;  %v240_v38 = vsub.f32 %v211_v10, %v236_v35  ;;  %v242_v41 = vsub.f32 %v213_v14, %v236_v35  ;;  %v244_v47 = vsub.f32 %v215_v18, %v236_v35 }
  0x45   : > { %v239_v39 = vsub.f32 %v210_v11, %v237_v36  ;;  %v241_v40 = vsub.f32 %v212_v12, %v237_v36  ;;  %v243_v44 = vsub.f32 %v214_v16, %v237_v36  ;;  %v245_v50 = vsub.f32 %v216_v20, %v237_v36 }
  0x46   : > { %v246_v42 = vmul.f32 %v238_v37, %v238_v37  ;;  %v248_v43 = vmul.f32 %v240_v38, %v240_v38  ;;  %v250_v48 = vmul.f32 %v242_v41, %v242_v41  ;;  %v252_v53 = vmul.f32 %v244_v47, %v244_v47 }
  0x47   : > { %v247_v45 = vmul.f32 %v239_v39, %v239_v39  ;;  %v249_v46 = vmul.f32 %v241_v40, %v241_v40  ;;  %v251_v51 = vmul.f32 %v243_v44, %v243_v44  ;;  %v253_v55 = vmul.f32 %v245_v50, %v245_v50 }
  0x48   : > { %v254_v49 = vadd.f32 %v248_v43, %v246_v42 }
  0x49   : > { %v263_v52 = vadd.f32 %v249_v46, %v247_v45 }
  0x4a   : > { %v255_v54 = vadd.f32 %v254_v49, %v250_v48 }
  0x4b   : > { %v264_v56 = vadd.f32 %v263_v52, %v251_v51 }
  0x4c   : > { %v256_v57 = vadd.f32 %v255_v54, %v252_v53 }
  0x4d   : > { %v265_v58 = vadd.f32 %v264_v56, %v253_v55 }
  0x4e   : > { %v257_v59 = vrot.slane %v256_v57, 4 }
  0x4f   : > { %v266_v60 = vrot.slane %v265_v58, 4 }
  0x50   : > { %v258_v61 = vadd.f32 %v257_v59, %v256_v57 }
  0x51   : > { %v267_v62 = vadd.f32 %v266_v60, %v265_v58 }
  0x52   : > { %v259_v63 = vrot.slane %v258_v61, 2 }
  0x53   : > { %v268_v0 = vrot.slane %v267_v62, 2 }
  0x54   : > { %v260_v1 = vadd.f32 %v259_v63, %v258_v61 }
  0x55   : > { %v269_v2 = vadd.f32 %v268_v0, %v267_v62 }
  0x56   : > { %v261_v3 = vrot.slane %v260_v1, 1 }
  0x57   : > { %v270_v4 = vrot.slane %v269_v2, 1 }
  0x58   : > { %v262_v5 = vadd.f32 %v261_v3, %v260_v1 }
  0x59   : > { %v271_v6 = vadd.f32 %v270_v4, %v269_v2 }
  0x5a   : > { %v272_v7 = vmul.f32 0.03125, %v262_v5 }
  0x5b   : > { %v273_v8 = vmul.f32 0.03125, %v271_v6 }
  0x5c   : > { %v274_v9 = vadd.f32 1e-05, %v272_v7 }
  0x5d   : > { %v275_v10 = vadd.f32 1e-05, %v273_v8 }
  0x5e   : > { %547 = vrsqrt.f32 %v274_v9 }
  0x5f   : > { %549 = vrsqrt.f32 %v275_v10 }
  0x6b   : > { %v548_v11 = vpop.eup %547 }
  0x6c   : > { %v550_v12 = vpop.eup %549  ;;  %v286_v15 = vmul.f32 %v548_v11, %v238_v37  ;;  %v288_v17 = vmul.f32 %v548_v11, %v240_v38  ;;  %v290_v21 = vmul.f32 %v548_v11, %v242_v41  ;;  %v292_v23 = vmul.f32 %v548_v11, %v244_v47 }
  0x6d   : > { %v287_v16 = vmul.f32 %v550_v12, %v239_v39  ;;  %v289_v18 = vmul.f32 %v550_v12, %v241_v40  ;;  %v291_v22 = vmul.f32 %v550_v12, %v243_v44  ;;  %v293_v24 = vmul.f32 %v550_v12, %v245_v50 }
  0xa9   : > { %v307_v13 = vpop.permute.xlu1 %306  ;;  %v297_v14 = vpop.permute.xlu0 %296 }
  0xaa   : > { %v314_v25 = vmul.f32 %v297_v14, %v286_v15  ;;  %v315_v26 = vmul.f32 %v297_v14, %v287_v16  ;;  %v318_v35 = vmul.f32 %v307_v13, %v290_v21  ;;  %v319_v36 = vmul.f32 %v307_v13, %v291_v22 }
  0xad   : > { %v312_v19 = vpop.permute.xlu1 %311  ;;  %v302_v20 = vpop.permute.xlu0 %301 }
  0xae   : > { %v316_v27 = vmul.f32 %v302_v20, %v288_v17  ;;  %v317_v28 = vmul.f32 %v302_v20, %v289_v18  ;;  %v320_v37 = vmul.f32 %v312_v19, %v292_v23  ;;  %v321_v38 = vmul.f32 %v312_v19, %v293_v24 }
  0xb1   : > { %v330_v29 = vpop.permute.xlu1 %329  ;;  %v325_v30 = vpop.permute.xlu0 %324 }
  0xb2   : > { %v344_v31 = vadd.f32 %v330_v29, %v316_v27  ;;  %v345_v32 = vadd.f32 %v330_v29, %v317_v28  ;;  %v342_v33 = vadd.f32 %v325_v30, %v314_v25  ;;  %v343_v34 = vadd.f32 %v325_v30, %v315_v26 }
  0xb4   : > { %352 = vst [vmem:[%s206_s4 + $0x10] sm:$0xff] %v344_v31  ;;  %353 = vst [vmem:[%s206_s4 + $0x18] sm:$0xff] %v345_v32 }
  0xb5   : > { %350 = vst [vmem:[%s206_s4] sm:$0xff] %v342_v33  ;;  %351 = vst [vmem:[%s206_s4 + $0x8] sm:$0xff] %v343_v34  ;;  %v340_v39 = vpop.permute.xlu1 %339  ;;  %v335_v40 = vpop.permute.xlu0 %334 }
  0xb6   : > { %v348_v41 = vadd.f32 %v340_v39, %v320_v37  ;;  %v349_v42 = vadd.f32 %v340_v39, %v321_v38  ;;  %v346_v43 = vadd.f32 %v335_v40, %v318_v35  ;;  %v347_v44 = vadd.f32 %v335_v40, %v319_v36 }
  0xb8   : > { %356 = vst [vmem:[%s206_s4 + $0x30] sm:$0xff] %v348_v41  ;;  %357 = vst [vmem:[%s206_s4 + $0x38] sm:$0xff] %v349_v42 }
  0xb9   : > { %354 = vst [vmem:[%s206_s4 + $0x20] sm:$0xff] %v346_v43  ;;  %355 = vst [vmem:[%s206_s4 + $0x28] sm:$0xff] %v347_v44 }
  0xba   : > { %592 = shalt.err (!%p589_p6)
}
  0xbb   : > { %s593_s21 = scalar_lea.hbm %s824_s15, 1024  ;;  %s597_s30 = scalar_lea.hbm %s875_s3, 2048 }
  0xbc   : > { %p594_p7 = scmp.ne.s32.totalorder %s824_s15, %s593_s21  ;;  %p598_p13 = scmp.lt.s32.totalorder %s824_s15, %s875_s3 }
  0xbd   : > { %p599_p2 = scmp.lt.s32.totalorder %s597_s30, %s593_s21 }
  0xbe   : > { %p595_p10 = pnand %p594_p7, %p739_p9 }
  0xbf   : > { %p600_p8 = por %p599_p2, %p598_p13 }
  0xc0   : > { %p596_p4 = pneg %p595_p10 }
  0xc2   : > { %p601_p12 = pnand %p600_p8, %p596_p4 }
  0xc4   : > { %604 = shalt.err (!%p601_p12)
}
  0xc5   : > { %s666_s4 = smov 256   ;;  %s667_s8 = smov 16  }
  0xc6   : > { %480 = dma.vmem_to_hbm [thread:$0]  (%p739_p9), %s819_s7, 1024, %s824_s15, %s359_s10, %s666_s4, %s666_s4, %s667_s8  }
  0xc7 PF: > { %s389_s29 = sand.u32 1, %s639_s12   ;;  %p881_p0 = scmp.ge.s32.totalorder %s659_s17, 2 }
  0xc8   : > { %s390_s9 = scalar_lea.sflag [#allocation4], %s389_s29 }
  0xc9   : > { %p487_p1 = pnand %p881_p0, %p746_p11 }
  0xcb   : > { %p488_p3 = pneg %p487_p1 }
  0xcd   : > { %634 = dma.done.wait (%p488_p3), %s390_s9, 1024  }
  0xce   : > { %636 = vsyncadd (%p488_p3), %s390_s9, 4294966272  ;;  %s19_s17 = sadd.s32 1, %s659_s17   ;;  %s882_s12 = smov %s643_s13 }
  0xcf   : > { %p16_p5 = scmp.ge.s32.totalorder %s19_s17, 4   ;;  %s883_s13 = smov %s647_s14 }
  0xd0   : > { %s884_s14 = smov %s744_s26  ;;  %s885_s15 = smov %s655_s16 }
  0xd1   : > { %s886_s16 = smov %s888_s20  ;;  %18 = sbr.rel (!%p16_p5) target bundleno = 6 (0x6), region = 77 }
  0xd6   :  { %395 = vsyncpa [#allocation3], 1 }
  0xd7   :  { %397 = vsyncpa [#allocation3 + $0x1], 1 }
  0xd8   :  { %398 = vsyncpa [#allocation4], 1 }
  0xd9   :  { %400 = vsyncpa [#allocation4 + $0x1], 1 }

</bundles_post_ra>
